<compile_context>
chip_gen: v7x
topology: tpu7x:2x2x1
jax: 0.10.0
libtpu: 0.0.40
codegen_flags: <defaults>
</compile_context>

<pallas_src>
from functools import partial

import jax
import jax.numpy as jnp
from jax.experimental import pallas as pl
from jax.experimental.pallas import tpu as pltpu


def _round_up(n: int, m: int) -> int:
    return ((n + m - 1) // m) * m


def _mlp_kernel(*refs, num_linear, fma_first_layer):
    """refs = (x_ref, w0_ref, b0_ref, w1_ref, b1_ref, ..., o_ref).

    ReLU after every linear layer except the last one
    (matching nn.Sequential(Linear, ReLU, ..., Linear)).
    """
    x_ref = refs[0]
    o_ref = refs[-1]
    wb = refs[1:-1]

    h = x_ref[...]                                     # (TB, F_in) activation dtype
    for li in range(num_linear):
        w = wb[2 * li][...]                            # (F_in, F_out) bf16 weights
        b = wb[2 * li + 1][...]                        # (1, F_out)    activation dtype
        if li == 0 and fma_first_layer:
            # K is tiny (5): a handful of broadcast FMAs on the VPU beats a
            # >95%-zero-padded MXU pass (and its weight push / fill-drain).
            acc = jnp.zeros((h.shape[0], w.shape[1]), jnp.float32)
            for k in range(w.shape[0]):
                acc = acc + (h[:, k:k + 1].astype(jnp.float32) *
                             w[k:k + 1, :].astype(jnp.float32))
        else:
            # bf16 x bf16 MXU matmul with f32 accumulation.
            acc = jnp.dot(h.astype(w.dtype), w,
                          preferred_element_type=jnp.float32)
        # Bias-add / ReLU in the (bf16) activation dtype: fewer VALU bytes per layer.
        h = acc.astype(b.dtype) + b
        if li < num_linear - 1:
            h = jnp.maximum(h, 0.0)                    # ReLU
    o_ref[...] = h.astype(o_ref.dtype)


def init_params(key, layers: int = 1, dimension: int = 512,
                weight_dtype=jnp.bfloat16):
    """Deterministic init matching the module's layer shapes.

    Returns a list of (W, b) with W of shape (in_features, out_features)
    stored in `weight_dtype` (bf16 by default), biases kept in f32 (cast to the
    activation dtype inside the wrapper).
    """
    dims = [(5, dimension)] + [(dimension, dimension)] * layers + [(dimension, 3)]
    params = []
    for (fan_in, fan_out) in dims:
        key, kw, kb = jax.random.split(key, 3)
        bound = 1.0 / float(fan_in) ** 0.5
        w = jax.random.uniform(kw, (fan_in, fan_out), jnp.float32, -bound, bound)
        b = jax.random.uniform(kb, (1, fan_out), jnp.float32, -bound, bound)
        params.append((w.astype(weight_dtype), b))
    return params


def neural_network_forward(x, params, *, block_batch: int = 512,
                           out_lane_pad: int = 128,
                           activation_dtype=jnp.bfloat16,
                           single_buffer_weight_threshold: int = 4 << 20):
    """x: any shape (B, ...) whose trailing dims flatten to 5 features.

    Note: on v5e pass activation_dtype=jnp.float32 (no bf16 VPU there).
    """
    B = x.shape[0]
    act_itemsize = jnp.dtype(activation_dtype).itemsize
    x2 = x.reshape(B, -1).astype(activation_dtype)      # nn.Flatten (+ bf16 input DMA)
    in_features = x2.shape[1]
    num_linear = len(params)
    out_dim = params[-1][0].shape[1]                     # true logits width (3)
    fma_first = in_features <= 8                         # degenerate-K first layer

    # --- Lane-dense output: pad the final layer to `out_lane_pad` columns. ---
    out_pad = max(out_lane_pad, out_dim)
    padded_params = []
    for li, (w, b) in enumerate(params):
        if li == num_linear - 1 and out_pad > out_dim:
            w = jnp.pad(w, ((0, 0), (0, out_pad - out_dim)))
            b = jnp.pad(b, ((0, 0), (0, out_pad - out_dim)))
        padded_params.append((w, b.astype(activation_dtype)))

    # --- Batch tiling: TB multiple of 8; whole batch in one step when tiny,   ---
    # --- >= 2 grid steps when large so v7x megacore sharding has work to do. ---
    tb_full = _round_up(B, 8)
    TB = min(block_batch, tb_full)
    if B >= 256:
        TB = min(TB, _round_up(pl.cdiv(tb_full, 2), 8))
    B_pad = _round_up(B, TB)
    if B_pad != B:
        x2 = jnp.pad(x2, ((0, B_pad - B), (0, 0)))
    grid = (pl.cdiv(B_pad, TB),)

    # --- Weight residency / buffering policy. ---
    weight_bytes = sum(int(w.size) * w.dtype.itemsize + int(b.size) * b.dtype.itemsize
                       for (w, b) in padded_params)
    single_buffer_weights = weight_bytes > single_buffer_weight_threshold
    weight_pipeline = pl.Buffered(1) if single_buffer_weights else None

    def _const_spec(shape):
        # Constant index_map => block never re-DMAs; single-buffer it when large.
        if weight_pipeline is not None:
            return pl.BlockSpec(shape, lambda i: (0, 0), pipeline_mode=weight_pipeline)
        return pl.BlockSpec(shape, lambda i: (0, 0))

    # --- Specs: activations/outputs tile over the grid, weights stay resident. ---
    flat_args = []
    in_specs = [pl.BlockSpec((TB, in_features), lambda i: (i, 0))]
    for (w, b) in padded_params:
        flat_args.append(w)
        in_specs.append(_const_spec(w.shape))
        flat_args.append(b)
        in_specs.append(_const_spec(b.shape))
    out_specs = pl.BlockSpec((TB, out_pad), lambda i: (i, 0))

    # --- Explicit VMEM budget only when the estimate exceeds the scoped default. ---
    max_width = max(int(w.shape[1]) for (w, _) in padded_params)
    vmem_est = (weight_bytes * (1 if single_buffer_weights else 2)
                + 2 * TB * in_features * act_itemsize      # double-buffered input
                + 2 * TB * out_pad * act_itemsize           # double-buffered output
                + 2 * TB * max_width * 4)                    # f32 accumulator headroom
    vmem_limit_bytes = None
    if vmem_est + (vmem_est >> 1) > (16 << 20):
        vmem_limit_bytes = min(vmem_est + (vmem_est >> 1) + (4 << 20), 64 << 20)

    # --- Advisory cost estimate for the XLA scheduler. ---
    flops = 2 * B_pad * sum(int(w.shape[0]) * int(w.shape[1])
                            for (w, _) in padded_params)
    act_bytes = (B_pad * in_features * act_itemsize
                 + B_pad * out_pad * act_itemsize)
    cost = pl.CostEstimate(flops=int(flops), transcendentals=0,
                           bytes_accessed=int(weight_bytes + act_bytes))

    kernel = partial(_mlp_kernel, num_linear=num_linear, fma_first_layer=fma_first)
    out = pl.pallas_call(
        kernel,
        out_shape=jax.ShapeDtypeStruct((B_pad, out_pad), activation_dtype),
        grid=grid,
        in_specs=in_specs,
        out_specs=out_specs,
        compiler_params=pltpu.CompilerParams(
            dimension_semantics=("parallel",),      # v7x: shard batch across 2 TCs
            vmem_limit_bytes=vmem_limit_bytes),
        cost_estimate=cost,
    )(x2, *flat_args)

    return out[:B, :out_dim].astype(jnp.float32)


def _reference_forward(x, params, activation_dtype=jnp.bfloat16):
    """Pure-JAX reference mirroring the kernel's exact dtype/accumulation path."""
    h = x.reshape(x.shape[0], -1).astype(activation_dtype)
    n = len(params)
    for li, (w, b) in enumerate(params):
        b = b.astype(activation_dtype)
        if li == 0 and w.shape[0] <= 8:
            acc = jnp.zeros((h.shape[0], w.shape[1]), jnp.float32)
            for k in range(w.shape[0]):
                acc = acc + (h[:, k:k + 1].astype(jnp.float32) *
                             w[k:k + 1, :].astype(jnp.float32))
        else:
            acc = jnp.dot(h.astype(w.dtype), w, preferred_element_type=jnp.float32)
        h = acc.astype(activation_dtype) + b
        if li < n - 1:
            h = jnp.maximum(h, 0.0)
    return h.astype(jnp.float32)


if __name__ == "__main__":
    # Small shapes consistent with the module: 5 input features, 3 output logits.
    LAYERS = 1
    DIMENSION = 128      # small stand-in for the default 512 hidden width
    BATCH = 16

    key = jax.random.PRNGKey(0)
    key, kx = jax.random.split(key)
    # Input has an extra singleton dim so the nn.Flatten-equivalent reshape is exercised.
    x = jax.random.normal(kx, (BATCH, 1, 5), jnp.float32)

    params = init_params(key, layers=LAYERS, dimension=DIMENSION)
    ref = _reference_forward(x, params)

    # Default path: tiny batch -> whole batch in a single grid step.
    logits = jax.block_until_ready(neural_network_forward(x, params))
    assert logits.shape == (BATCH, 3), logits.shape
    assert jnp.allclose(logits, ref, atol=2e-2, rtol=2e-2), "mismatch (single-step)"

    # Forced small tile: exercises the multi-step batch pipeline (grid=(2,)).
    logits2 = jax.block_until_ready(
        neural_network_forward(x, params, block_batch=8))
    assert jnp.allclose(logits2, ref, atol=2e-2, rtol=2e-2), "mismatch (tiled)"

    print("KERNEL_OK")
</pallas_src>

<mosaic_0001>
module attributes {stable_mosaic.version = 11 : i64} {
  func.func @_mlp_kernel(%arg0: i32, %arg1: memref<16x5xbf16, #tpu.memory_space<vmem>>, %arg2: memref<5x128xbf16, #tpu.memory_space<vmem>>, %arg3: memref<1x128xbf16, #tpu.memory_space<vmem>>, %arg4: memref<128x128xbf16, #tpu.memory_space<vmem>>, %arg5: memref<1x128xbf16, #tpu.memory_space<vmem>>, %arg6: memref<128x128xbf16, #tpu.memory_space<vmem>>, %arg7: memref<1x128xbf16, #tpu.memory_space<vmem>>, %arg8: memref<16x128xbf16, #tpu.memory_space<vmem>>) attributes {dimension_semantics = [#tpu.dimension_semantics<parallel>], iteration_bounds = array<i64: 1>, scalar_prefetch = 0 : i64, scratch_operands = 0 : i64, tpu.core_type = #tpu.core_type<tc>, window_params = [{transform_indices = @transform_0, window_bounds = array<i64: 16, 5>}, {pipeline_mode = #tpu.pipeline_mode<synchronous>, transform_indices = @transform_1, window_bounds = array<i64: 5, 128>}, {pipeline_mode = #tpu.pipeline_mode<synchronous>, transform_indices = @transform_2, window_bounds = array<i64: 1, 128>}, {pipeline_mode = #tpu.pipeline_mode<synchronous>, transform_indices = @transform_3, window_bounds = array<i64: 128, 128>}, {pipeline_mode = #tpu.pipeline_mode<synchronous>, transform_indices = @transform_4, window_bounds = array<i64: 1, 128>}, {pipeline_mode = #tpu.pipeline_mode<synchronous>, transform_indices = @transform_5, window_bounds = array<i64: 128, 128>}, {pipeline_mode = #tpu.pipeline_mode<synchronous>, transform_indices = @transform_6, window_bounds = array<i64: 1, 128>}, {transform_indices = @transform_7, window_bounds = array<i64: 16, 128>}]} {
    %c0 = arith.constant 0 : index
    %c0_0 = arith.constant 0 : index
    %0 = vector.load %arg1[%c0, %c0_0] : memref<16x5xbf16, #tpu.memory_space<vmem>>, vector<16x5xbf16>
    %c0_1 = arith.constant 0 : index
    %c0_2 = arith.constant 0 : index
    %1 = vector.load %arg2[%c0_1, %c0_2] : memref<5x128xbf16, #tpu.memory_space<vmem>>, vector<5x128xbf16>
    %c0_3 = arith.constant 0 : index
    %c0_4 = arith.constant 0 : index
    %2 = vector.load %arg3[%c0_3, %c0_4] : memref<1x128xbf16, #tpu.memory_space<vmem>>, vector<1x128xbf16>
    %cst = arith.constant 0.000000e+00 : f32
    %3 = vector.broadcast %cst : f32 to vector<16x128xf32>
    %4 = vector.extract_strided_slice %0 {offsets = [0, 0], sizes = [16, 1], strides = [1, 1]} : vector<16x5xbf16> to vector<16x1xbf16>
    %5 = arith.extf %4 : vector<16x1xbf16> to vector<16x1xf32>
    %6 = vector.extract_strided_slice %1 {offsets = [0, 0], sizes = [1, 128], strides = [1, 1]} : vector<5x128xbf16> to vector<1x128xbf16>
    %7 = arith.extf %6 : vector<1x128xbf16> to vector<1x128xf32>
    %8 = vector.broadcast %5 : vector<16x1xf32> to vector<16x128xf32>
    %9 = vector.broadcast %7 : vector<1x128xf32> to vector<16x128xf32>
    %10 = arith.mulf %8, %9 : vector<16x128xf32>
    %11 = arith.addf %3, %10 : vector<16x128xf32>
    %12 = vector.extract_strided_slice %0 {offsets = [0, 1], sizes = [16, 1], strides = [1, 1]} : vector<16x5xbf16> to vector<16x1xbf16>
    %13 = arith.extf %12 : vector<16x1xbf16> to vector<16x1xf32>
    %14 = vector.extract_strided_slice %1 {offsets = [1, 0], sizes = [1, 128], strides = [1, 1]} : vector<5x128xbf16> to vector<1x128xbf16>
    %15 = arith.extf %14 : vector<1x128xbf16> to vector<1x128xf32>
    %16 = vector.broadcast %13 : vector<16x1xf32> to vector<16x128xf32>
    %17 = vector.broadcast %15 : vector<1x128xf32> to vector<16x128xf32>
    %18 = arith.mulf %16, %17 : vector<16x128xf32>
    %19 = arith.addf %11, %18 : vector<16x128xf32>
    %20 = vector.extract_strided_slice %0 {offsets = [0, 2], sizes = [16, 1], strides = [1, 1]} : vector<16x5xbf16> to vector<16x1xbf16>
    %21 = arith.extf %20 : vector<16x1xbf16> to vector<16x1xf32>
    %22 = vector.extract_strided_slice %1 {offsets = [2, 0], sizes = [1, 128], strides = [1, 1]} : vector<5x128xbf16> to vector<1x128xbf16>
    %23 = arith.extf %22 : vector<1x128xbf16> to vector<1x128xf32>
    %24 = vector.broadcast %21 : vector<16x1xf32> to vector<16x128xf32>
    %25 = vector.broadcast %23 : vector<1x128xf32> to vector<16x128xf32>
    %26 = arith.mulf %24, %25 : vector<16x128xf32>
    %27 = arith.addf %19, %26 : vector<16x128xf32>
    %28 = vector.extract_strided_slice %0 {offsets = [0, 3], sizes = [16, 1], strides = [1, 1]} : vector<16x5xbf16> to vector<16x1xbf16>
    %29 = arith.extf %28 : vector<16x1xbf16> to vector<16x1xf32>
    %30 = vector.extract_strided_slice %1 {offsets = [3, 0], sizes = [1, 128], strides = [1, 1]} : vector<5x128xbf16> to vector<1x128xbf16>
    %31 = arith.extf %30 : vector<1x128xbf16> to vector<1x128xf32>
    %32 = vector.broadcast %29 : vector<16x1xf32> to vector<16x128xf32>
    %33 = vector.broadcast %31 : vector<1x128xf32> to vector<16x128xf32>
    %34 = arith.mulf %32, %33 : vector<16x128xf32>
    %35 = arith.addf %27, %34 : vector<16x128xf32>
    %36 = vector.extract_strided_slice %0 {offsets = [0, 4], sizes = [16, 1], strides = [1, 1]} : vector<16x5xbf16> to vector<16x1xbf16>
    %37 = arith.extf %36 : vector<16x1xbf16> to vector<16x1xf32>
    %38 = vector.extract_strided_slice %1 {offsets = [4, 0], sizes = [1, 128], strides = [1, 1]} : vector<5x128xbf16> to vector<1x128xbf16>
    %39 = arith.extf %38 : vector<1x128xbf16> to vector<1x128xf32>
    %40 = vector.broadcast %37 : vector<16x1xf32> to vector<16x128xf32>
    %41 = vector.broadcast %39 : vector<1x128xf32> to vector<16x128xf32>
    %42 = arith.mulf %40, %41 : vector<16x128xf32>
    %43 = arith.addf %35, %42 : vector<16x128xf32>
    %44 = arith.truncf %43 : vector<16x128xf32> to vector<16x128xbf16>
    %45 = vector.broadcast %2 : vector<1x128xbf16> to vector<16x128xbf16>
    %46 = arith.addf %44, %45 : vector<16x128xbf16>
    %cst_5 = arith.constant 0.000000e+00 : bf16
    %47 = vector.broadcast %cst_5 : bf16 to vector<16x128xbf16>
    %48 = arith.maximumf %46, %47 : vector<16x128xbf16>
    %c0_6 = arith.constant 0 : index
    %c0_7 = arith.constant 0 : index
    %49 = vector.load %arg4[%c0_6, %c0_7] : memref<128x128xbf16, #tpu.memory_space<vmem>>, vector<128x128xbf16>
    %c0_8 = arith.constant 0 : index
    %c0_9 = arith.constant 0 : index
    %50 = vector.load %arg5[%c0_8, %c0_9] : memref<1x128xbf16, #tpu.memory_space<vmem>>, vector<1x128xbf16>
    %cst_10 = arith.constant dense<0.000000e+00> : vector<16x128xf32>
    %51 = tpu.matmul %48, %49, %cst_10 {dimension_numbers = #tpu.dot_dimension_numbers<[1], [0], [0], [1], [0, 0, 1, 1], [], []>} : vector<16x128xbf16>, vector<128x128xbf16>, vector<16x128xf32> -> vector<16x128xf32>
    %52 = arith.truncf %51 : vector<16x128xf32> to vector<16x128xbf16>
    %53 = vector.broadcast %50 : vector<1x128xbf16> to vector<16x128xbf16>
    %54 = arith.addf %52, %53 : vector<16x128xbf16>
    %cst_11 = arith.constant 0.000000e+00 : bf16
    %55 = vector.broadcast %cst_11 : bf16 to vector<16x128xbf16>
    %56 = arith.maximumf %54, %55 : vector<16x128xbf16>
    %c0_12 = arith.constant 0 : index
    %c0_13 = arith.constant 0 : index
    %57 = vector.load %arg6[%c0_12, %c0_13] : memref<128x128xbf16, #tpu.memory_space<vmem>>, vector<128x128xbf16>
    %c0_14 = arith.constant 0 : index
    %c0_15 = arith.constant 0 : index
    %58 = vector.load %arg7[%c0_14, %c0_15] : memref<1x128xbf16, #tpu.memory_space<vmem>>, vector<1x128xbf16>
    %cst_16 = arith.constant dense<0.000000e+00> : vector<16x128xf32>
    %59 = tpu.matmul %56, %57, %cst_16 {dimension_numbers = #tpu.dot_dimension_numbers<[1], [0], [0], [1], [0, 0, 1, 1], [], []>} : vector<16x128xbf16>, vector<128x128xbf16>, vector<16x128xf32> -> vector<16x128xf32>
    %60 = arith.truncf %59 : vector<16x128xf32> to vector<16x128xbf16>
    %61 = vector.broadcast %58 : vector<1x128xbf16> to vector<16x128xbf16>
    %62 = arith.addf %60, %61 : vector<16x128xbf16>
    %c0_17 = arith.constant 0 : index
    %c0_18 = arith.constant 0 : index
    %63 = vector.load %arg8[%c0_17, %c0_18] : memref<16x128xbf16, #tpu.memory_space<vmem>>, vector<16x128xbf16>
    tpu.vector_store %arg8[%c0_17, %c0_18], %62 {strides = array<i32>} : memref<16x128xbf16, #tpu.memory_space<vmem>>, vector<16x128xbf16>,
    return
  }
  func.func @transform_0(%arg0: i32) -> (i32, i32) {
    %c0_i32 = arith.constant 0 : i32
    %c0_i32_0 = arith.constant 0 : i32
    return %arg0, %c0_i32 : i32, i32
  }
  func.func @transform_1(%arg0: i32) -> (i32, i32) {
    %c0_i32 = arith.constant 0 : i32
    %c0_i32_0 = arith.constant 0 : i32
    %c0_i32_1 = arith.constant 0 : i32
    return %c0_i32, %c0_i32_0 : i32, i32
  }
  func.func @transform_2(%arg0: i32) -> (i32, i32) {
    %c0_i32 = arith.constant 0 : i32
    %c0_i32_0 = arith.constant 0 : i32
    %c0_i32_1 = arith.constant 0 : i32
    return %c0_i32, %c0_i32_0 : i32, i32
  }
  func.func @transform_3(%arg0: i32) -> (i32, i32) {
    %c0_i32 = arith.constant 0 : i32
    %c0_i32_0 = arith.constant 0 : i32
    %c0_i32_1 = arith.constant 0 : i32
    return %c0_i32, %c0_i32_0 : i32, i32
  }
  func.func @transform_4(%arg0: i32) -> (i32, i32) {
    %c0_i32 = arith.constant 0 : i32
    %c0_i32_0 = arith.constant 0 : i32
    %c0_i32_1 = arith.constant 0 : i32
    return %c0_i32, %c0_i32_0 : i32, i32
  }
  func.func @transform_5(%arg0: i32) -> (i32, i32) {
    %c0_i32 = arith.constant 0 : i32
    %c0_i32_0 = arith.constant 0 : i32
    %c0_i32_1 = arith.constant 0 : i32
    return %c0_i32, %c0_i32_0 : i32, i32
  }
  func.func @transform_6(%arg0: i32) -> (i32, i32) {
    %c0_i32 = arith.constant 0 : i32
    %c0_i32_0 = arith.constant 0 : i32
    %c0_i32_1 = arith.constant 0 : i32
    return %c0_i32, %c0_i32_0 : i32, i32
  }
  func.func @transform_7(%arg0: i32) -> (i32, i32) {
    %c0_i32 = arith.constant 0 : i32
    %c0_i32_0 = arith.constant 0 : i32
    return %arg0, %c0_i32 : i32, i32
  }
}

</mosaic_0001>

<bundles_post_ra>
// kernel: tpu_custom_call.1
= control target key start
LH: loop header
LB: loop body
LE: loop exit
PB: predicated region body
PF: predicated region fallthrough
CT: control target
= control target key end

     0   :  { %12 = vsyncpa [#allocation3], 0  ;;  %s763_s0 = inlined_call_operand.vmem [shape: bf16[16,5], index: 0, kind: input, shape index: {}]   ;;  %s764_s1 = inlined_call_operand.vmem [shape: bf16[5,128], index: 1, kind: input, shape index: {}]   ;;  %s765_s2 = inlined_call_operand.vmem [shape: bf16[1,128], index: 2, kind: input, shape index: {}]   ;;  %s766_s3 = inlined_call_operand.hbm [shape: bf16[128,128], index: 3, kind: input, shape index: {}]   ;;  %s767_s4 = inlined_call_operand.vmem [shape: bf16[1,128], index: 4, kind: input, shape index: {}]   ;;  %s768_s5 = inlined_call_operand.hbm [shape: bf16[128,128], index: 5, kind: input, shape index: {}]   ;;  %s769_s6 = inlined_call_operand.vmem [shape: bf16[1,128], index: 6, kind: input, shape index: {}]   ;;  %s770_s7 = inlined_call_operand.hbm [shape: bf16[16,128], index: 7, kind: output, shape index: {}]  }
   0x1   :  { %13 = vsyncpa [#allocation6], 0 }
   0x2   :  { %14 = vsyncpa [#allocation4], 0  ;;  %s624_s24 = smov [#allocation2]   ;;  %s552_s28 = scalar_lea.hbm %s766_s3, 1024 }
   0x3   :  { %s26_s25 = sshll.u32 %s624_s24, 4  ;;  %p553_p0 = scmp.ne.s32.totalorder %s766_s3, %s552_s28  ;;  %s27_s25 = int_to_ptr.vmem [resolvable:$true] %s26_s25 }
   0x4   :  { %p556_p1 = scmp.lt.u32.totalorder %s552_s28, %s766_s3 }
   0x6   :  { %p558_p2 = pnand %p556_p1, %p553_p0 }
   0x8   :  { %561 = shalt.err (!%p558_p2)
}
   0x9   :  { %s562_s10 = scalar_lea.vmem %s27_s25, 1024  ;;  %p567_p4 = scmp.lt.s32.totalorder %s27_s25, %s27_s25 }
   0xa   :  { %p563_p3 = scmp.ne.s32.totalorder %s27_s25, %s562_s10  ;;  %p568_p5 = scmp.lt.s32.totalorder %s562_s10, %s562_s10 }
   0xc   :  { %p569_p6 = por %p568_p5, %p567_p4 }
   0xe   :  { %p570_p7 = pnand %p569_p6, %p563_p3 }
  0x10   :  { %573 = shalt.err (!%p570_p7)
}
  0x11   :  { %s625_s11 = smov 64   ;;  %s626_s12 = smov 4  }
  0x12   :  { %32 = dma.hbm_to_vmem [thread:$0]  %s766_s3, 1024, %s27_s25, [#allocation3], %s625_s11, %s625_s11, %s626_s12  }
  0x13   :  { %s627_s15 = smov [#allocation5]   ;;  %s574_s19 = scalar_lea.hbm %s768_s5, 1024 }
  0x14   :  { %s40_s16 = sshll.u32 %s627_s15, 4  ;;  %p575_p8 = scmp.ne.s32.totalorder %s768_s5, %s574_s19  ;;  %s41_s16 = int_to_ptr.vmem [resolvable:$true] %s40_s16 }
  0x15   :  { %p578_p9 = scmp.lt.u32.totalorder %s574_s19, %s768_s5 }
  0x17   :  { %p580_p10 = pnand %p578_p9, %p575_p8 }
  0x19   :  { %583 = shalt.err (!%p580_p10)
}
  0x1a   :  { %s584_s24 = scalar_lea.vmem %s41_s16, 1024  ;;  %p589_p12 = scmp.lt.s32.totalorder %s41_s16, %s41_s16 }
  0x1b   :  { %p585_p11 = scmp.ne.s32.totalorder %s41_s16, %s584_s24  ;;  %p590_p13 = scmp.lt.s32.totalorder %s584_s24, %s584_s24 }
  0x1d   :  { %p591_p0 = por %p590_p13, %p589_p12 }
  0x1f   :  { %p592_p1 = pnand %p591_p0, %p585_p11 }
  0x21   :  { %595 = shalt.err (!%p592_p1)
}
  0x22   :  { %46 = dma.hbm_to_vmem [thread:$0]  %s768_s5, 1024, %s41_s16, [#allocation6], %s625_s11, %s625_s11, %s626_s12  }
  0x23   :  { %618 = dma.done.wait [#allocation3], 1024  }
  0x24   :  { %619 = vsyncadd [#allocation3], 4294966272 }
  0x25   :  { %620 = dma.done.wait [#allocation6], 1024  }
  0x26   :  { %621 = vsyncadd [#allocation6], 4294966272  ;;  %v628_v0 = vmov 0   ;;  %v629_v1 = vmov 2   ;;  %v630_v2 = vmov 0.0   ;;  %v432_v3 = vld [vmem:[%s763_s0] sm:$0xff]   ;;  %v73_v24 = vlaneseq }
  0x27   :  { %505 = vset.pattern.permute.xlu0 %v628_v0  ;;  %517 = vset.pattern.permute.xlu1 %v629_v1  ;;  %v433_v4 = vunpack.c.l.bf16 %v432_v3  ;;  %v434_v5 = vunpack.c.h.bf16 %v432_v3  ;;  %v536_v6 = vld [vmem:[#allocation2] sm:$0xff]   ;;  %v537_v8 = vld [vmem:[#allocation2 + $0x8] sm:$0xff]   ;;  %v538_v9 = vld [vmem:[#allocation2 + $0x10] sm:$0xff]   ;;  %v631_v10 = vmov 1   ;;  %v632_v11 = vmov 3  }
  0x28   :  { %453 = vmatprep.subr.bf16.mxu0 %v630_v2  ;;  %473 = vmatprep.subr.bf16.mxu1 %v630_v2  ;;  %v539_v12 = vld [vmem:[#allocation2 + $0x18] sm:$0xff]   ;;  %v633_v13 = vmov 4   ;;  %v540_v14 = vld [vmem:[#allocation2 + $0x20] sm:$0xff]   ;;  %v541_v15 = vld [vmem:[#allocation2 + $0x28] sm:$0xff]   ;;  %vm634_vm0 = vmmov 0   ;;  %v74_v25 = vshrl.u32 %v73_v24, 7 }
  0x29   :  { %v506_v7 = vpack.i.bf16 %v434_v5, %v433_v4  ;;  %454 = vmatpush3.bf16.msra.mxu0 %v536_v6  ;;  %v542_v16 = vld [vmem:[#allocation2 + $0x30] sm:$0xff]   ;;  %469 = vmatprep.mubr.msk.bf16.mxu0 %vm634_vm0, %v630_v2  ;;  %v543_v17 = vld [vmem:[#allocation2 + $0x38] sm:$0xff]   ;;  %v544_v18 = vld [vmem:[#allocation5] sm:$0xff]  }
  0x2a   :  { %455 = vmatprep.subr.bf16.mxu0 %v630_v2  ;;  %489 = vmatprep.mubr.msk.bf16.mxu1 %vm634_vm0, %v630_v2  ;;  %v545_v19 = vld [vmem:[#allocation5 + $0x8] sm:$0xff]   ;;  %v546_v20 = vld [vmem:[#allocation5 + $0x10] sm:$0xff]   ;;  %v547_v21 = vld [vmem:[#allocation5 + $0x18] sm:$0xff]   ;;  %v730_v28 = vsub.s32 0, %v74_v25  ;;  %v91_v31 = vsub.s32 1, %v74_v25  ;;  %v107_v32 = vsub.s32 2, %v74_v25 }
  0x2b   :  { %507 = vperm.xlu0 %505, %v506_v7   ;;  %519 = vperm.xlu1 %517, %v506_v7   ;;  %v548_v22 = vld [vmem:[#allocation5 + $0x20] sm:$0xff]   ;;  %v549_v23 = vld [vmem:[#allocation5 + $0x28] sm:$0xff]   ;;  %v123_v36 = vsub.s32 3, %v74_v25  ;;  %v139_v41 = vsub.s32 4, %v74_v25 }
  0x2c   :  { %474 = vmatpush3.bf16.msra.mxu1 %v544_v18  ;;  %v58_v26 = vld [vmem:[%s764_s1] sm:$0x7] }
  0x2d   :  { %456 = vmatpush3.bf16.msra.mxu0 %v537_v8  ;;  %475 = vmatprep.subr.bf16.mxu1 %v630_v2  ;;  %v62_v27 = vunpack.c.l.bf16 %v58_v26  ;;  %v59_v53 = vld [vmem:[%s765_s2] sm:$0x1] }
  0x2e   :  { %457 = vmatprep.subr.bf16.mxu0 %v630_v2  ;;  %v147_v62 = vpack.i.b16 %v59_v53, %v59_v53 }
  0x2f   :  { %511 = vset.pattern.permute.xlu0 %v631_v10  ;;  %523 = vset.pattern.permute.xlu1 %v632_v11  ;;  %v76_v33 = vrot.slane %v62_v27, %v730_v28  ;;  %v92_v37 = vrot.slane %v62_v27, %v91_v31  ;;  %v108_v38 = vrot.slane %v62_v27, %v107_v32 }
  0x30   :  { %513 = vperm.xlu0 %511, %v506_v7   ;;  %525 = vperm.xlu1 %523, %v506_v7   ;;  %v124_v48 = vrot.slane %v62_v27, %v123_v36  ;;  %v140_v54 = vrot.slane %v62_v27, %v139_v41  ;;  %v152_v11 = vrot.slane %v147_v62, %v730_v28 }
  0x31   :  { %458 = vmatpush3.bf16.msra.mxu0 %v538_v9  ;;  %476 = vmatpush3.bf16.msra.mxu1 %v545_v19 }
  0x32   :  { %459 = vmatprep.subr.bf16.mxu0 %v630_v2  ;;  %477 = vmatprep.subr.bf16.mxu1 %v630_v2 }
  0x34   :  { %529 = vset.pattern.permute.xlu1 %v633_v13  ;;  %535 = vset.pattern.permute.xlu0 %v633_v13 }
  0x35   :  { %531 = vperm.xlu1 %529, %v506_v7   ;;  %460 = vmatpush3.bf16.msra.mxu0 %v539_v12 }
  0x36   :  { %461 = vmatprep.subr.bf16.mxu0 %v630_v2  ;;  %478 = vmatpush3.bf16.msra.mxu1 %v546_v20 }
  0x37   :  { %479 = vmatprep.subr.bf16.mxu1 %v630_v2 }
  0x39   :  { %462 = vmatpush3.bf16.msra.mxu0 %v540_v14 }
  0x3a   :  { %463 = vmatprep.subr.bf16.mxu0 %v630_v2  ;;  %480 = vmatpush3.bf16.msra.mxu1 %v547_v21 }
  0x3b   :  { %481 = vmatprep.subr.bf16.mxu1 %v630_v2 }
  0x3d   :  { %464 = vmatpush3.bf16.msra.mxu0 %v541_v15  ;;  %v550_v15 = vld [vmem:[#allocation5 + $0x30] sm:$0xff]  }
  0x3e   :  { %465 = vmatprep.subr.bf16.mxu0 %v630_v2  ;;  %482 = vmatpush3.bf16.msra.mxu1 %v548_v22 }
  0x3f   :  { %483 = vmatprep.subr.bf16.mxu1 %v630_v2 }
  0x41   :  { %466 = vmatpush3.bf16.msra.mxu0 %v542_v16  ;;  %v551_v16 = vld [vmem:[#allocation5 + $0x38] sm:$0xff]  }
  0x42   :  { %467 = vmatprep.subr.bf16.mxu0 %v630_v2  ;;  %484 = vmatpush3.bf16.msra.mxu1 %v549_v23 }
  0x43   :  { %485 = vmatprep.subr.bf16.mxu1 %v630_v2 }
  0x45   :  { %468 = vmatpush3.bf16.msra.mxu0 %v543_v17  ;;  %v171_v17 = vld [vmem:[%s767_s4] sm:$0x1]  ;;  %s635_s4 = smov [#allocation7]  }
  0x46   :  { %486 = vmatpush3.bf16.msra.mxu1 %v550_v15  ;;  %v263_v18 = vpack.i.b16 %v171_v17, %v171_v17  ;;  %s400_s9 = sshll.u32 %s635_s4, 4  ;;  %s401_s9 = int_to_ptr.vmem [resolvable:$true] %s400_s9 }
  0x47   :  { %487 = vmatprep.subr.bf16.mxu1 %v630_v2  ;;  %v287_v2 = vld [vmem:[%s769_s6] sm:$0x1]  ;;  %s596_s10 = scalar_lea.vmem %s401_s9, 128  ;;  %p601_p3 = scmp.lt.s32.totalorder %s401_s9, %s401_s9 }
  0x48   :  { %v268_v21 = vrot.slane %v263_v18, %v730_v28  ;;  %v379_v27 = vpack.i.b16 %v287_v2, %v287_v2  ;;  %p597_p2 = scmp.ne.s32.totalorder %s401_s9, %s596_s10  ;;  %p602_p4 = scmp.lt.s32.totalorder %s596_s10, %s596_s10 }
  0x4a   :  { %488 = vmatpush3.bf16.msra.mxu1 %v551_v16  ;;  %v384_v31 = vrot.slane %v379_v27, %v730_v28  ;;  %p603_p5 = por %p602_p4, %p601_p3 }
  0x4c   :  { %p604_p6 = pnand %p603_p5, %p597_p2 }
  0xaa   :  { %v508_v29 = vpop.permute.xlu0 %507  ;;  %v520_v30 = vpop.permute.xlu1 %519 }
  0xab   :  { %v510_v34 = vunpack.i.h.bf16 %v508_v29  ;;  %v509_v35 = vunpack.i.l.bf16 %v508_v29  ;;  %v522_v42 = vunpack.i.h.bf16 %v520_v30  ;;  %v521_v43 = vunpack.i.l.bf16 %v520_v30 }
  0xad   :  { %v78_v46 = vmul.f32 %v510_v34, %v76_v33  ;;  %v77_v47 = vmul.f32 %v509_v35, %v76_v33  ;;  %v110_v55 = vmul.f32 %v522_v42, %v108_v38  ;;  %v109_v56 = vmul.f32 %v521_v43, %v108_v38 }
  0xaf   :  { %v514_v39 = vpop.permute.xlu0 %513  ;;  %v526_v40 = vpop.permute.xlu1 %525 }
  0xb0   :  { %v516_v44 = vunpack.i.h.bf16 %v514_v39  ;;  %v515_v45 = vunpack.i.l.bf16 %v514_v39  ;;  %v528_v51 = vunpack.i.h.bf16 %v526_v40  ;;  %v527_v52 = vunpack.i.l.bf16 %v526_v40 }
  0xb2   :  { %v94_v49 = vmul.f32 %v516_v44, %v92_v37  ;;  %v93_v50 = vmul.f32 %v515_v45, %v92_v37  ;;  %v126_v3 = vmul.f32 %v528_v51, %v124_v48  ;;  %v125_v4 = vmul.f32 %v527_v52, %v124_v48 }
  0xb4   :  { %v95_v57 = vadd.f32 %v93_v50, %v77_v47  ;;  %v96_v58 = vadd.f32 %v94_v49, %v78_v46  ;;  %v532_v59 = vpop.permute.xlu1 %531 }
  0xb5   :  { %v534_v60 = vunpack.i.h.bf16 %v532_v59  ;;  %v533_v61 = vunpack.i.l.bf16 %v532_v59 }
  0xb6   :  { %v111_v63 = vadd.f32 %v109_v56, %v95_v57  ;;  %v112_v1 = vadd.f32 %v110_v55, %v96_v58 }
  0xb7   :  { %v142_v5 = vmul.f32 %v534_v60, %v140_v54  ;;  %v141_v6 = vmul.f32 %v533_v61, %v140_v54 }
  0xb8   :  { %v127_v7 = vadd.f32 %v125_v4, %v111_v63  ;;  %v128_v8 = vadd.f32 %v126_v3, %v112_v1 }
  0xba   :  { %v143_v9 = vadd.f32 %v141_v6, %v127_v7  ;;  %v144_v10 = vadd.f32 %v142_v5, %v128_v8 }
  0xbc   :  { %v145_v12 = vpack.c.bf16 %v144_v10, %v143_v9 }
  0xbe   :  { %v153_v13 = vadd.bf16 %v152_v11, %v145_v12 }
  0xc0   :  { %v154_v14 = vmax.bf16 %v628_v0, %v153_v13 }
  0xc2   :  { %470 = vmatmul.mubr.bf16.vlgmr.msra.gmra.mrb[0].mxu0 %v154_v14 }
 0x195   :  { %v254_v19 = vpop.f32.mrb[0].mxu0 }
 0x196   :  { %v471_v20 = vpop.f32.mrb[1].mxu0 }
 0x197   :  { %v257_v22 = vpop.f32.mrb[2].mxu0 }
 0x198   :  { %v261_v23 = vpack.c.bf16 %v257_v22, %v254_v19  ;;  %v472_v24 = vpop.f32.mrb[3].mxu0 }
 0x19a   :  { %v269_v25 = vadd.bf16 %v268_v21, %v261_v23 }
 0x19c   :  { %v270_v26 = vmax.bf16 %v628_v0, %v269_v25 }
 0x19e   :  { %490 = vmatmul.mubr.bf16.vlgmr.msra.gmra.mrb[0].mxu1 %v270_v26 }
 0x271   :  { %v370_v29 = vpop.f32.mrb[0].mxu1 }
 0x272   :  { %v491_v30 = vpop.f32.mrb[1].mxu1 }
 0x273   :  { %v373_v32 = vpop.f32.mrb[2].mxu1 }
 0x274   :  { %v377_v33 = vpack.c.bf16 %v373_v32, %v370_v29  ;;  %v492_v34 = vpop.f32.mrb[3].mxu1 }
 0x276   :  { %v385_v35 = vadd.bf16 %v384_v31, %v377_v33 }
 0x278   :  { %v429_v36 = vcombine.low %v385_v35, %v385_v35  ;;  %v430_v37 = vcombine.high %v385_v35, %v385_v35 }
 0x27a   :  { %393 = vst [vmem:[#allocation7] sm:$0xf] %v429_v36  ;;  %394 = vst [vmem:[#allocation7 + $0x4] sm:$0xf] %v430_v37 }
 0x27b   :  { %607 = shalt.err (!%p604_p6)
}
 0x27c   :  { %s608_s14 = scalar_lea.hbm %s770_s7, 128 }
 0x27d   :  { %p609_p7 = scmp.ne.s32.totalorder %s770_s7, %s608_s14  ;;  %p612_p8 = scmp.lt.u32.totalorder %s608_s14, %s770_s7 }
 0x27f   :  { %p614_p9 = pnand %p612_p8, %p609_p7 }
 0x281   :  { %617 = shalt.err (!%p614_p9)
}
 0x282   :  { %406 = dma.vmem_to_hbm [thread:$0]  %s401_s9, 128, %s770_s7, [#allocation4], %s625_s11, %s625_s11, %s626_s12  }
 0x283   :  { %622 = dma.done.wait [#allocation4], 128  }
 0x284   :  { %623 = vsyncadd [#allocation4], 4294967168 }
 0x285   :  { %410 = vsyncpa [#allocation3], 1 }
 0x286   :  { %411 = vsyncpa [#allocation6], 1 }
 0x287   :  { %412 = vsyncpa [#allocation4], 1 }

</bundles_post_ra>
